<compile_context>
chip_gen: v7x
topology: tpu7x:2x2x1
jax: 0.10.0
libtpu: 0.0.40
codegen_flags: <defaults>
</compile_context>

<pallas_src>
import functools

import jax
import jax.numpy as jnp
from jax import lax
from jax.experimental import pallas as pl
from jax.experimental.pallas import tpu as pltpu


def _round_up(x, m):
    return (x + m - 1) // m * m


# --------------------------------------------------------------------------
# Pallas kernel
# --------------------------------------------------------------------------
def _make_eco_kernel(kernel_size, dilation, w_padded):
    """Direct dilated conv on one batch element (channels on sublanes,
    flattened padded plane on lanes)."""

    def kernel(w_ref, b_ref, x_ref, o_ref):
        c_out, l_out = o_ref.shape
        acc = jnp.zeros((c_out, l_out), jnp.float32)
        for kh in range(kernel_size):
            for kw in range(kernel_size):
                start = (kh * w_padded + kw) * dilation          # static offset
                x_slab = x_ref[:, start:start + l_out]           # contiguous view
                acc = acc + jnp.dot(
                    w_ref[kh * kernel_size + kw], x_slab,
                    preferred_element_type=jnp.float32)
        o_ref[...] = (acc + b_ref[...]).astype(o_ref.dtype)

    return kernel


def eco_direct_conv_pallas(x_flat, w_taps, bias_col, *, kernel_size, dilation,
                           w_padded, l_out):
    """out[b, :, :] = sum_taps W_tap @ shift(x_flat[b]) + bias."""
    B, C, hw_pad = x_flat.shape
    T, C2, C3 = w_taps.shape
    assert C2 == C and C3 == C and T == kernel_size * kernel_size

    return pl.pallas_call(
        _make_eco_kernel(kernel_size, dilation, w_padded),
        out_shape=jax.ShapeDtypeStruct((B, C, l_out), jnp.float32),
        grid_spec=pltpu.PrefetchScalarGridSpec(
            num_scalar_prefetch=0,
            grid=(B,),
            in_specs=[
                # tiny per-tap weights + bias: constant index map -> resident
                pl.BlockSpec((T, C, C), lambda b: (0, 0, 0)),
                pl.BlockSpec((C, 1), lambda b: (0, 0)),
                # one zero-padded flattened plane per batch element
                pl.BlockSpec((None, C, hw_pad), lambda b: (b, 0, 0)),
            ],
            out_specs=pl.BlockSpec((None, C, l_out), lambda b: (b, 0, 0)),
        ),
        compiler_params=pltpu.CompilerParams(
            dimension_semantics=("parallel",),
            vmem_limit_bytes=32 * 1024 * 1024,
        ),
    )(w_taps, bias_col, x_flat)


# --------------------------------------------------------------------------
# ECO forward (wrapper glue + Pallas hot path)
# --------------------------------------------------------------------------
def eco_forward(x, weight, bias, *, in_channels, out_channels,
                kernel_size=3, stride=1):
    """Reproduces ECO.forward(x) for NCHW float32 input x."""
    B, C_in, H_in, W_in = x.shape
    assert C_in == in_channels

    # einops: 'b c (w k1) (h k2) -> b (c k1 k2) w h'   (space-to-depth)
    if stride > 1:
        k1 = k2 = stride
        h2, w2 = H_in // k1, W_in // k2
        x = x.reshape(B, C_in, h2, k1, w2, k2)
        x = x.transpose(0, 1, 3, 5, 2, 4).reshape(B, C_in * k1 * k2, h2, w2)

    eff_in = in_channels * stride * stride
    max_ch = max(out_channels, eff_in)

    # channel zero-pad (F.pad with p4d = (0,0,0,0,0,diff,0,0))
    if out_channels > eff_in:
        x = jnp.pad(x, ((0, 0), (0, out_channels - eff_in), (0, 0), (0, 0)))

    # dilation / padding rules from the module (static at trace time)
    sp = x.shape[-1]
    dilation = max(1, sp // kernel_size)
    padding = max(1, sp // kernel_size) if kernel_size > 1 else 0

    Bx, C0, Hx, Wx = x.shape
    assert C0 == max_ch

    # pad channels up to a multiple of 8 so sublane dims are aligned
    C = max(8, _round_up(C0, 8))
    if C != C0:
        x = jnp.pad(x, ((0, 0), (0, C - C0), (0, 0), (0, 0)))
        weight = jnp.pad(weight, ((0, C - C0), (0, C - C0), (0, 0), (0, 0)))
        bias = jnp.pad(bias, ((0, C - C0),))

    Hp, Wp = Hx + 2 * padding, Wx + 2 * padding
    H_out = Hp - dilation * (kernel_size - 1)
    W_out = Wp - dilation * (kernel_size - 1)
    T = kernel_size * kernel_size
    l_out = H_out * Wp                       # full-width rows; junk cols sliced later

    # spatial zero-pad, flatten the plane, add tail zeros so every shifted
    # tap view stays in-bounds (no OOB VMEM reads)
    x_pad = jnp.pad(x, ((0, 0), (0, 0), (padding, padding), (padding, padding)))
    hw = Hp * Wp
    hw_pad = _round_up(hw + (kernel_size - 1) * dilation, 128)
    x_flat = jnp.pad(x_pad.reshape(Bx, C, hw),
                     ((0, 0), (0, 0), (0, hw_pad - hw)))

    # torch conv weight [O, I, kh, kw] -> per-tap [T, C_out, C_in]
    w_taps = jnp.transpose(weight, (2, 3, 0, 1)).reshape(T, C, C)

    out = eco_direct_conv_pallas(
        x_flat, w_taps, bias.reshape(C, 1),
        kernel_size=kernel_size, dilation=dilation, w_padded=Wp, l_out=l_out)

    # drop junk columns, padded channels, and (if out < eff_in) sliced channels
    out = out.reshape(Bx, C, H_out, Wp)[:, :out_channels, :, :W_out]
    return out


# --------------------------------------------------------------------------
# Pure-JAX reference replicating the PyTorch semantics
# --------------------------------------------------------------------------
def _reference(x, weight, bias, *, in_channels, out_channels,
               kernel_size, stride):
    eff_in = in_channels * stride * stride
    x_ref = x
    if stride > 1:
        k1 = k2 = stride
        B, C_in, H_in, W_in = x.shape
        h2, w2 = H_in // k1, W_in // k2
        x_ref = x.reshape(B, C_in, h2, k1, w2, k2)
        x_ref = x_ref.transpose(0, 1, 3, 5, 2, 4).reshape(
            B, C_in * k1 * k2, h2, w2)
    if out_channels > eff_in:
        x_ref = jnp.pad(
            x_ref, ((0, 0), (0, out_channels - eff_in), (0, 0), (0, 0)))
    sp = x_ref.shape[-1]
    d = max(1, sp // kernel_size)
    p = max(1, sp // kernel_size) if kernel_size > 1 else 0
    ref = lax.conv_general_dilated(
        x_ref, weight, window_strides=(1, 1), padding=[(p, p), (p, p)],
        rhs_dilation=(d, d),
        dimension_numbers=("NCHW", "OIHW", "NCHW"),
        precision=lax.Precision.HIGHEST) + bias[None, :, None, None]
    if out_channels < eff_in:
        ref = ref[:, :out_channels, :, :]
    return ref


if __name__ == "__main__":
    configs = [
        # primary: channel-pad path
        dict(B=2, in_channels=4, out_channels=8, spatial=(16, 16),
             kernel_size=3, stride=1),
        # larger spatial plane
        dict(B=2, in_channels=4, out_channels=8, spatial=(32, 32),
             kernel_size=3, stride=1),
        # out < in slice path, non-square spatial
        dict(B=1, in_channels=8, out_channels=4, spatial=(12, 10),
             kernel_size=3, stride=1),
        # stride > 1 space-to-depth path
        dict(B=2, in_channels=4, out_channels=8, spatial=(16, 16),
             kernel_size=3, stride=2),
    ]

    key = jax.random.PRNGKey(0)
    for cfg in configs:
        key, kx, kw, kb = jax.random.split(key, 4)
        B = cfg["B"]
        in_ch, out_ch = cfg["in_channels"], cfg["out_channels"]
        ks, stride = cfg["kernel_size"], cfg["stride"]
        Hs, Ws = cfg["spatial"]

        x = jax.random.normal(kx, (B, in_ch, Hs, Ws), jnp.float32)

        max_ch = max(out_ch, in_ch * stride * stride)
        fan_in = max_ch * ks * ks
        bound = 1.0 / (fan_in ** 0.5)
        weight = jax.random.uniform(
            kw, (max_ch, max_ch, ks, ks), jnp.float32, -bound, bound)
        bias = jax.random.uniform(kb, (max_ch,), jnp.float32, -bound, bound)

        fwd = jax.jit(functools.partial(
            eco_forward, in_channels=in_ch, out_channels=out_ch,
            kernel_size=ks, stride=stride))
        out = jax.block_until_ready(fwd(x, weight, bias))

        ref = _reference(x, weight, bias, in_channels=in_ch,
                         out_channels=out_ch, kernel_size=ks, stride=stride)

        assert out.shape == ref.shape, (out.shape, ref.shape)
        assert bool(jnp.allclose(out, ref, atol=2e-4, rtol=2e-4)), cfg

    print("KERNEL_OK")
</pallas_src>

<mosaic_0001>
module attributes {stable_mosaic.version = 11 : i64} {
  func.func @kernel(%arg0: i32, %arg1: memref<9x8x8xf32, #tpu.memory_space<vmem>>, %arg2: memref<8x1xf32, #tpu.memory_space<vmem>>, %arg3: memref<1x8x768xf32, #tpu.memory_space<vmem>>, %arg4: memref<1x8x416xf32, #tpu.memory_space<vmem>>) attributes {dimension_semantics = [#tpu.dimension_semantics<parallel>], iteration_bounds = array<i64: 2>, scalar_prefetch = 0 : i64, scratch_operands = 0 : i64, tpu.core_type = #tpu.core_type<tc>, window_params = [{pipeline_mode = #tpu.pipeline_mode<synchronous>, transform_indices = @transform_0, window_bounds = array<i64: 9, 8, 8>}, {pipeline_mode = #tpu.pipeline_mode<synchronous>, transform_indices = @transform_1, window_bounds = array<i64: 8, 1>}, {transform_indices = @transform_2, window_bounds = array<i64: 1, 8, 768>}, {transform_indices = @transform_3, window_bounds = array<i64: 1, 8, 416>}]} {
    %cst = arith.constant 0.000000e+00 : f32
    %0 = vector.broadcast %cst : f32 to vector<8x416xf32>
    %c0 = arith.constant 0 : index
    %c0_0 = arith.constant 0 : index
    %c0_1 = arith.constant 0 : index
    %1 = vector.load %arg3[%c0, %c0_0, %c0_1] : memref<1x8x768xf32, #tpu.memory_space<vmem>>, vector<1x8x416xf32>
    %2 = vector.shape_cast %1 : vector<1x8x416xf32> to vector<8x416xf32>
    %c0_2 = arith.constant 0 : index
    %c0_3 = arith.constant 0 : index
    %c0_4 = arith.constant 0 : index
    %3 = vector.load %arg1[%c0_2, %c0_3, %c0_4] : memref<9x8x8xf32, #tpu.memory_space<vmem>>, vector<1x8x8xf32>
    %4 = vector.shape_cast %3 : vector<1x8x8xf32> to vector<8x8xf32>
    %cst_5 = arith.constant dense<0.000000e+00> : vector<8x416xf32>
    %5 = tpu.matmul %4, %2, %cst_5 {dimension_numbers = #tpu.dot_dimension_numbers<[1], [0], [0], [1], [0, 0, 1, 1], [], []>} : vector<8x8xf32>, vector<8x416xf32>, vector<8x416xf32> -> vector<8x416xf32>
    %6 = arith.addf %0, %5 : vector<8x416xf32>
    %c0_6 = arith.constant 0 : index
    %c0_7 = arith.constant 0 : index
    %c5 = arith.constant 5 : index
    %7 = vector.load %arg3[%c0_6, %c0_7, %c5] : memref<1x8x768xf32, #tpu.memory_space<vmem>>, vector<1x8x416xf32>
    %8 = vector.shape_cast %7 : vector<1x8x416xf32> to vector<8x416xf32>
    %c1 = arith.constant 1 : index
    %c0_8 = arith.constant 0 : index
    %c0_9 = arith.constant 0 : index
    %9 = vector.load %arg1[%c1, %c0_8, %c0_9] : memref<9x8x8xf32, #tpu.memory_space<vmem>>, vector<1x8x8xf32>
    %10 = vector.shape_cast %9 : vector<1x8x8xf32> to vector<8x8xf32>
    %cst_10 = arith.constant dense<0.000000e+00> : vector<8x416xf32>
    %11 = tpu.matmul %10, %8, %cst_10 {dimension_numbers = #tpu.dot_dimension_numbers<[1], [0], [0], [1], [0, 0, 1, 1], [], []>} : vector<8x8xf32>, vector<8x416xf32>, vector<8x416xf32> -> vector<8x416xf32>
    %12 = arith.addf %6, %11 : vector<8x416xf32>
    %c0_11 = arith.constant 0 : index
    %c0_12 = arith.constant 0 : index
    %c10 = arith.constant 10 : index
    %13 = vector.load %arg3[%c0_11, %c0_12, %c10] : memref<1x8x768xf32, #tpu.memory_space<vmem>>, vector<1x8x416xf32>
    %14 = vector.shape_cast %13 : vector<1x8x416xf32> to vector<8x416xf32>
    %c2 = arith.constant 2 : index
    %c0_13 = arith.constant 0 : index
    %c0_14 = arith.constant 0 : index
    %15 = vector.load %arg1[%c2, %c0_13, %c0_14] : memref<9x8x8xf32, #tpu.memory_space<vmem>>, vector<1x8x8xf32>
    %16 = vector.shape_cast %15 : vector<1x8x8xf32> to vector<8x8xf32>
    %cst_15 = arith.constant dense<0.000000e+00> : vector<8x416xf32>
    %17 = tpu.matmul %16, %14, %cst_15 {dimension_numbers = #tpu.dot_dimension_numbers<[1], [0], [0], [1], [0, 0, 1, 1], [], []>} : vector<8x8xf32>, vector<8x416xf32>, vector<8x416xf32> -> vector<8x416xf32>
    %18 = arith.addf %12, %17 : vector<8x416xf32>
    %c0_16 = arith.constant 0 : index
    %c0_17 = arith.constant 0 : index
    %c130 = arith.constant 130 : index
    %19 = vector.load %arg3[%c0_16, %c0_17, %c130] : memref<1x8x768xf32, #tpu.memory_space<vmem>>, vector<1x8x416xf32>
    %20 = vector.shape_cast %19 : vector<1x8x416xf32> to vector<8x416xf32>
    %c3 = arith.constant 3 : index
    %c0_18 = arith.constant 0 : index
    %c0_19 = arith.constant 0 : index
    %21 = vector.load %arg1[%c3, %c0_18, %c0_19] : memref<9x8x8xf32, #tpu.memory_space<vmem>>, vector<1x8x8xf32>
    %22 = vector.shape_cast %21 : vector<1x8x8xf32> to vector<8x8xf32>
    %cst_20 = arith.constant dense<0.000000e+00> : vector<8x416xf32>
    %23 = tpu.matmul %22, %20, %cst_20 {dimension_numbers = #tpu.dot_dimension_numbers<[1], [0], [0], [1], [0, 0, 1, 1], [], []>} : vector<8x8xf32>, vector<8x416xf32>, vector<8x416xf32> -> vector<8x416xf32>
    %24 = arith.addf %18, %23 : vector<8x416xf32>
    %c0_21 = arith.constant 0 : index
    %c0_22 = arith.constant 0 : index
    %c135 = arith.constant 135 : index
    %25 = vector.load %arg3[%c0_21, %c0_22, %c135] : memref<1x8x768xf32, #tpu.memory_space<vmem>>, vector<1x8x416xf32>
    %26 = vector.shape_cast %25 : vector<1x8x416xf32> to vector<8x416xf32>
    %c4 = arith.constant 4 : index
    %c0_23 = arith.constant 0 : index
    %c0_24 = arith.constant 0 : index
    %27 = vector.load %arg1[%c4, %c0_23, %c0_24] : memref<9x8x8xf32, #tpu.memory_space<vmem>>, vector<1x8x8xf32>
    %28 = vector.shape_cast %27 : vector<1x8x8xf32> to vector<8x8xf32>
    %cst_25 = arith.constant dense<0.000000e+00> : vector<8x416xf32>
    %29 = tpu.matmul %28, %26, %cst_25 {dimension_numbers = #tpu.dot_dimension_numbers<[1], [0], [0], [1], [0, 0, 1, 1], [], []>} : vector<8x8xf32>, vector<8x416xf32>, vector<8x416xf32> -> vector<8x416xf32>
    %30 = arith.addf %24, %29 : vector<8x416xf32>
    %c0_26 = arith.constant 0 : index
    %c0_27 = arith.constant 0 : index
    %c140 = arith.constant 140 : index
    %31 = vector.load %arg3[%c0_26, %c0_27, %c140] : memref<1x8x768xf32, #tpu.memory_space<vmem>>, vector<1x8x416xf32>
    %32 = vector.shape_cast %31 : vector<1x8x416xf32> to vector<8x416xf32>
    %c5_28 = arith.constant 5 : index
    %c0_29 = arith.constant 0 : index
    %c0_30 = arith.constant 0 : index
    %33 = vector.load %arg1[%c5_28, %c0_29, %c0_30] : memref<9x8x8xf32, #tpu.memory_space<vmem>>, vector<1x8x8xf32>
    %34 = vector.shape_cast %33 : vector<1x8x8xf32> to vector<8x8xf32>
    %cst_31 = arith.constant dense<0.000000e+00> : vector<8x416xf32>
    %35 = tpu.matmul %34, %32, %cst_31 {dimension_numbers = #tpu.dot_dimension_numbers<[1], [0], [0], [1], [0, 0, 1, 1], [], []>} : vector<8x8xf32>, vector<8x416xf32>, vector<8x416xf32> -> vector<8x416xf32>
    %36 = arith.addf %30, %35 : vector<8x416xf32>
    %c0_32 = arith.constant 0 : index
    %c0_33 = arith.constant 0 : index
    %c260 = arith.constant 260 : index
    %37 = vector.load %arg3[%c0_32, %c0_33, %c260] : memref<1x8x768xf32, #tpu.memory_space<vmem>>, vector<1x8x416xf32>
    %38 = vector.shape_cast %37 : vector<1x8x416xf32> to vector<8x416xf32>
    %c6 = arith.constant 6 : index
    %c0_34 = arith.constant 0 : index
    %c0_35 = arith.constant 0 : index
    %39 = vector.load %arg1[%c6, %c0_34, %c0_35] : memref<9x8x8xf32, #tpu.memory_space<vmem>>, vector<1x8x8xf32>
    %40 = vector.shape_cast %39 : vector<1x8x8xf32> to vector<8x8xf32>
    %cst_36 = arith.constant dense<0.000000e+00> : vector<8x416xf32>
    %41 = tpu.matmul %40, %38, %cst_36 {dimension_numbers = #tpu.dot_dimension_numbers<[1], [0], [0], [1], [0, 0, 1, 1], [], []>} : vector<8x8xf32>, vector<8x416xf32>, vector<8x416xf32> -> vector<8x416xf32>
    %42 = arith.addf %36, %41 : vector<8x416xf32>
    %c0_37 = arith.constant 0 : index
    %c0_38 = arith.constant 0 : index
    %c265 = arith.constant 265 : index
    %43 = vector.load %arg3[%c0_37, %c0_38, %c265] : memref<1x8x768xf32, #tpu.memory_space<vmem>>, vector<1x8x416xf32>
    %44 = vector.shape_cast %43 : vector<1x8x416xf32> to vector<8x416xf32>
    %c7 = arith.constant 7 : index
    %c0_39 = arith.constant 0 : index
    %c0_40 = arith.constant 0 : index
    %45 = vector.load %arg1[%c7, %c0_39, %c0_40] : memref<9x8x8xf32, #tpu.memory_space<vmem>>, vector<1x8x8xf32>
    %46 = vector.shape_cast %45 : vector<1x8x8xf32> to vector<8x8xf32>
    %cst_41 = arith.constant dense<0.000000e+00> : vector<8x416xf32>
    %47 = tpu.matmul %46, %44, %cst_41 {dimension_numbers = #tpu.dot_dimension_numbers<[1], [0], [0], [1], [0, 0, 1, 1], [], []>} : vector<8x8xf32>, vector<8x416xf32>, vector<8x416xf32> -> vector<8x416xf32>
    %48 = arith.addf %42, %47 : vector<8x416xf32>
    %c0_42 = arith.constant 0 : index
    %c0_43 = arith.constant 0 : index
    %c270 = arith.constant 270 : index
    %49 = vector.load %arg3[%c0_42, %c0_43, %c270] : memref<1x8x768xf32, #tpu.memory_space<vmem>>, vector<1x8x416xf32>
    %50 = vector.shape_cast %49 : vector<1x8x416xf32> to vector<8x416xf32>
    %c8 = arith.constant 8 : index
    %c0_44 = arith.constant 0 : index
    %c0_45 = arith.constant 0 : index
    %51 = vector.load %arg1[%c8, %c0_44, %c0_45] : memref<9x8x8xf32, #tpu.memory_space<vmem>>, vector<1x8x8xf32>
    %52 = vector.shape_cast %51 : vector<1x8x8xf32> to vector<8x8xf32>
    %cst_46 = arith.constant dense<0.000000e+00> : vector<8x416xf32>
    %53 = tpu.matmul %52, %50, %cst_46 {dimension_numbers = #tpu.dot_dimension_numbers<[1], [0], [0], [1], [0, 0, 1, 1], [], []>} : vector<8x8xf32>, vector<8x416xf32>, vector<8x416xf32> -> vector<8x416xf32>
    %54 = arith.addf %48, %53 : vector<8x416xf32>
    %c0_47 = arith.constant 0 : index
    %c0_48 = arith.constant 0 : index
    %55 = vector.load %arg2[%c0_47, %c0_48] : memref<8x1xf32, #tpu.memory_space<vmem>>, vector<8x1xf32>
    %56 = vector.broadcast %55 : vector<8x1xf32> to vector<8x416xf32>
    %57 = arith.addf %54, %56 : vector<8x416xf32>
    %c0_49 = arith.constant 0 : index
    %c0_50 = arith.constant 0 : index
    %c0_51 = arith.constant 0 : index
    %58 = vector.load %arg4[%c0_49, %c0_50, %c0_51] : memref<1x8x416xf32, #tpu.memory_space<vmem>>, vector<1x8x416xf32>
    %59 = vector.shape_cast %58 : vector<1x8x416xf32> to vector<8x416xf32>
    %60 = vector.shape_cast %57 : vector<8x416xf32> to vector<1x8x416xf32>
    tpu.vector_store %arg4[%c0_49, %c0_50, %c0_51], %60 {strides = array<i32>} : memref<1x8x416xf32, #tpu.memory_space<vmem>>, vector<1x8x416xf32>,
    return
  }
  func.func @transform_0(%arg0: i32) -> (i32, i32, i32) {
    %c0_i32 = arith.constant 0 : i32
    %c0_i32_0 = arith.constant 0 : i32
    %c0_i32_1 = arith.constant 0 : i32
    %c0_i32_2 = arith.constant 0 : i32
    return %c0_i32, %c0_i32_0, %c0_i32_1 : i32, i32, i32
  }
  func.func @transform_1(%arg0: i32) -> (i32, i32) {
    %c0_i32 = arith.constant 0 : i32
    %c0_i32_0 = arith.constant 0 : i32
    %c0_i32_1 = arith.constant 0 : i32
    return %c0_i32, %c0_i32_0 : i32, i32
  }
  func.func @transform_2(%arg0: i32) -> (i32, i32, i32) {
    %c0_i32 = arith.constant 0 : i32
    %c0_i32_0 = arith.constant 0 : i32
    %c0_i32_1 = arith.constant 0 : i32
    return %arg0, %c0_i32, %c0_i32_0 : i32, i32, i32
  }
  func.func @transform_3(%arg0: i32) -> (i32, i32, i32) {
    %c0_i32 = arith.constant 0 : i32
    %c0_i32_0 = arith.constant 0 : i32
    %c0_i32_1 = arith.constant 0 : i32
    return %arg0, %c0_i32, %c0_i32_0 : i32, i32, i32
  }
}

</mosaic_0001>

<bundles_post_ra>
// kernel: eco_forward.1
= control target key start
LH: loop header
LB: loop body
LE: loop exit
PB: predicated region body
PF: predicated region fallthrough
CT: control target
= control target key end

     0   :  { %s1871_s12 = smov 0   ;;  %s2022_s0 = inlined_call_operand.vmem [shape: f32[9,8,8], index: 0, kind: input, shape index: {}]   ;;  %s2023_s1 = inlined_call_operand.vmem [shape: f32[8,1], index: 1, kind: input, shape index: {}]   ;;  %s2024_s2 = inlined_call_operand.vmem [shape: f32[2,8,768], index: 2, kind: input, shape index: {}]   ;;  %s2025_s3 = inlined_call_operand.vmem [shape: f32[2,8,416], index: 3, kind: output, shape index: {}]  }
   0x1 LB: > { %s1744_s13 = sadd.s32 4294967295, %s1839_s12   ;;  %p1748_p0 = scmp.ge.s32.totalorder %s1839_s12, 1  ;;  %s1839_s12 = sphi %s1871_s12, %s13_s12  }
   0x2   : > { %p137_p1 = scmp.lt.s32.totalorder %s1839_s12, 3 }
   0x4   : > { %p138_p2 = pnand %p1748_p0, %p137_p1 }
   0x5   : > { %p161_p3 = scmp.lt.s32.totalorder (!%p138_p2), %s1744_s13, 1  ;;  %v1841_v0 = vmov (!%p138_p2), 0.0   ;;  %s1842_s18 = smov (!%p138_p2), 123   ;;  %v1850_v7 = vmov (!%p138_p2), 0   ;;  %v1674_v8 = vld [vmem:[%s2023_s1] sm:$0xff] (!%p138_p2)  ;;  %vm190_vm0 = vcmask (!%p138_p2), 1006592  }
   0x6   : > { %141 = sbr.rel (%p138_p2) target bundleno = 420 (0x1a4), region = 32  ;;  %337 = vmatprep.mubr.f32.mxu1 (!%p138_p2), %v1841_v0  ;;  %266 = vmatprep.mubr.f32.mxu0 (!%p138_p2), %v1841_v0  ;;  %s1843_s19 = smov (!%p138_p2), 118   ;;  %v1752_v13 = vld [vmem:[%s2022_s0 + $0x8] sm:$0xff] (!%p138_p2)  ;;  %vm198_vm1 = vcmask (!%p138_p2), 64512   ;;  %vm499_vm2 = vcmask (!%p138_p2), 965632   ;;  %v175_v22 = vld [vmem:[%s2022_s0] sm:$0xff] (!%p138_p2) }
   0x7   : > { %s1844_s20 = smov (!%p138_p2), 126   ;;  %s1845_s21 = smov (!%p138_p2), 121   ;;  %1832 = vset.pattern.permute.xlu0 (!%p138_p2), %v1850_v7  ;;  %vm674_vm3 = vcmask (!%p138_p2), 1031168   ;;  %v1757_v30 = vld [vmem:[%s2022_s0 + $0x10] sm:$0xff] (!%p138_p2)  ;;  %vm841_vm4 = vcmask (!%p138_p2), 990208   ;;  %v1760_v38 = vld [vmem:[%s2022_s0 + $0x18] sm:$0xff] (!%p138_p2) }
   0x8   : > { %s1846_s22 = smov (!%p138_p2), 116   ;;  %s1847_s23 = smov (!%p138_p2), 124   ;;  %vm1008_vm5 = vcmask (!%p138_p2), 949248   ;;  %v1763_v46 = vld [vmem:[%s2022_s0 + $0x20] sm:$0xff] (!%p138_p2)  ;;  %vm1183_vm6 = vcmask (!%p138_p2), 1014784   ;;  %v1766_v54 = vld [vmem:[%s2022_s0 + $0x28] sm:$0xff] (!%p138_p2) }
   0x9   : > { %s1848_s24 = smov (!%p138_p2), 119   ;;  %s1849_s25 = smov (!%p138_p2), 114   ;;  %vm1350_vm7 = vcmask (!%p138_p2), 973824   ;;  %v1769_v62 = vld [vmem:[%s2022_s0 + $0x30] sm:$0xff] (!%p138_p2)  ;;  %vm1517_vm8 = vcmask (!%p138_p2), 932864   ;;  %v1772_v7 = vld [vmem:[%s2022_s0 + $0x38] sm:$0xff] (!%p138_p2) }
   0xa   : > { %vm1687_vm9 = vcmask (!%p138_p2), 261120  }
   0xd   : > { %s2027_s13 = smov (!%p161_p3, %s1744_s13), 1 }
   0xe   : > { %s1813_s14 = smul.u32 48, %s2027_s13 }
  0x10   : > { %s1887_s17 = scalar_lea.vmem %s2024_s2, %s1813_s14 }
  0x11   : > { %v1890_v1 = vld [vmem:[%s1887_s17 + $0x8] sm:$0xff]  ;;  %v1893_v2 = vld [vmem:[%s1887_s17] sm:$0xff]  ;;  %v1898_v3 = vld [vmem:[%s1887_s17 + $0x10] sm:$0xff] }
  0x12   : > { %184 = vrot.lane.b32.xlu0 %v1890_v1, %s1842_s18  ;;  %182 = vrot.lane.b32.xlu1 %v1893_v2, %s1842_s18  ;;  %v1901_v4 = vld [vmem:[%s1887_s17 + $0x18] sm:$0xff]  ;;  %v659_v5 = vld [vmem:[%s1887_s17 + $0x20] sm:$0xff] }
  0x13   : > { %v1168_v6 = vld [vmem:[%s1887_s17 + $0x28] sm:$0xff] }
  0x16   : > { %186 = vrot.lane.b32.xlu0 %v1898_v3, %s1842_s18  ;;  %188 = vrot.lane.b32.xlu1 %v1901_v4, %s1842_s18 }
  0x1a   : > { %493 = vrot.lane.b32.xlu0 %v1890_v1, %s1843_s19  ;;  %495 = vrot.lane.b32.xlu1 %v1898_v3, %s1843_s19 }
  0x1e   : > { %491 = vrot.lane.b32.xlu0 %v1893_v2, %s1843_s19  ;;  %497 = vrot.lane.b32.xlu1 %v1901_v4, %s1843_s19 }
  0x22   : > { %668 = vrot.lane.b32.xlu0 %v1898_v3, %s1844_s20  ;;  %670 = vrot.lane.b32.xlu1 %v1901_v4, %s1844_s20 }
  0x26   : > { %666 = vrot.lane.b32.xlu0 %v1890_v1, %s1844_s20  ;;  %672 = vrot.lane.b32.xlu1 %v659_v5, %s1844_s20 }
  0x2a   : > { %835 = vrot.lane.b32.xlu0 %v1898_v3, %s1845_s21  ;;  %837 = vrot.lane.b32.xlu1 %v1901_v4, %s1845_s21 }
  0x2e   : > { %833 = vrot.lane.b32.xlu0 %v1890_v1, %s1845_s21  ;;  %839 = vrot.lane.b32.xlu1 %v659_v5, %s1845_s21  ;;  %s1780_s21 = sshll.u32 %s2027_s13, 5 }
  0x32   : > { %1002 = vrot.lane.b32.xlu0 %v1898_v3, %s1846_s22  ;;  %1004 = vrot.lane.b32.xlu1 %v1901_v4, %s1846_s22 }
  0x36   : > { %1000 = vrot.lane.b32.xlu0 %v1890_v1, %s1846_s22  ;;  %1006 = vrot.lane.b32.xlu1 %v659_v5, %s1846_s22 }
  0x3a   : > { %1177 = vrot.lane.b32.xlu0 %v1901_v4, %s1847_s23  ;;  %1179 = vrot.lane.b32.xlu1 %v659_v5, %s1847_s23 }
  0x3e   : > { %1175 = vrot.lane.b32.xlu0 %v1898_v3, %s1847_s23  ;;  %1181 = vrot.lane.b32.xlu1 %v1168_v6, %s1847_s23 }
  0x42   : > { %1344 = vrot.lane.b32.xlu0 %v1901_v4, %s1848_s24  ;;  %1346 = vrot.lane.b32.xlu1 %v659_v5, %s1848_s24 }
  0x46   : > { %1342 = vrot.lane.b32.xlu0 %v1898_v3, %s1848_s24  ;;  %1348 = vrot.lane.b32.xlu1 %v1168_v6, %s1848_s24  ;;  %s170_s24 = scalar_lea.vmem %s2025_s3, %s1780_s21 }
  0x4a   : > { %1511 = vrot.lane.b32.xlu0 %v1901_v4, %s1849_s25  ;;  %1513 = vrot.lane.b32.xlu1 %v659_v5, %s1849_s25 }
  0x4e   : > { %1509 = vrot.lane.b32.xlu0 %v1898_v3, %s1849_s25  ;;  %1515 = vrot.lane.b32.xlu1 %v1168_v6, %s1849_s25 }
  0x52   : > { %1677 = vperm.xlu0 %1832, %v1674_v8  }
  0x84   : > { %v185_v9 = vpop.permute.xlu0 %184  ;;  %v183_v10 = vpop.permute.xlu1 %182 }
  0x85   : > { %v191_v16 = vsel %vm190_vm0, %v183_v10, %v185_v9  ;;  %v1775_v10 = vld [vmem:[%s2022_s0 + $0x40] sm:$0xff] }
  0x88   : > { %v187_v11 = vpop.permute.xlu0 %186  ;;  %v189_v12 = vpop.permute.xlu1 %188 }
  0x89   : > { %273 = vmatprep.subr.mxu1 %v189_v12  ;;  %v192_v14 = vsel %vm190_vm0, %v185_v9, %v187_v11  ;;  %v193_v15 = vsel %vm190_vm0, %v187_v11, %v189_v12 }
  0x8a   : > { %202 = vmatprep.subr.mxu0 %v192_v14  ;;  %274 = vmatpush1.msra.mxu1 %v193_v15 }
  0x8b   : > { %203 = vmatpush1.msra.mxu0 %v191_v16  ;;  %1754 = vmatmul.mubr.msk.f32.vlgmr.msra.gmra.mrb[0].mxu1 %vm198_vm1, %v1752_v13 }
  0x8c   : > { %v494_v17 = vpop.permute.xlu0 %493  ;;  %1753 = vmatmul.mubr.msk.f32.vlgmr.msra.gmra.mrb[0].mxu0 %vm198_vm1, %v1752_v13  ;;  %347 = vmatprep.subr.mxu0 %v1890_v1  ;;  %v496_v18 = vpop.permute.xlu1 %495 }
  0x8d   : > { %418 = vmatprep.subr.mxu1 %v1901_v4  ;;  %348 = vmatpush1.msra.mxu0 %v1893_v2  ;;  %v501_v19 = vsel %vm499_vm2, %v494_v17, %v496_v18 }
  0x8e   : > { %419 = vmatpush1.msra.mxu1 %v1898_v3  ;;  %510 = vmatprep.subr.mxu0 %v501_v19 }
  0x8f   : > { %482 = vmatprep.mubr.f32.mxu1 %v1841_v0  ;;  %411 = vmatprep.mubr.f32.mxu0 %v1841_v0 }
  0x90   : > { %v492_v20 = vpop.permute.xlu0 %491  ;;  %v498_v21 = vpop.permute.xlu1 %497 }
  0x91   : > { %v502_v23 = vsel %vm499_vm2, %v496_v18, %v498_v21  ;;  %581 = vmatprep.subr.mxu1 %v498_v21  ;;  %v500_v24 = vsel %vm499_vm2, %v492_v20, %v494_v17 }
  0x93   : > { %1756 = vmatmul.mubr.msk.f32.vlgmr.msra.gmra.mrb[0].mxu1 %vm198_vm1, %v175_v22 }
  0x94   : > { %582 = vmatpush1.msra.mxu1 %v502_v23  ;;  %v669_v25 = vpop.permute.xlu0 %668  ;;  %1755 = vmatmul.mubr.msk.f32.vlgmr.msra.gmra.mrb[0].mxu0 %vm198_vm1, %v175_v22  ;;  %v671_v26 = vpop.permute.xlu1 %670 }
  0x95   : > { %511 = vmatpush1.msra.mxu0 %v500_v24  ;;  %v676_v27 = vsel %vm674_vm3, %v669_v25, %v671_v26  ;;  %645 = vmatprep.mubr.f32.mxu1 %v1841_v0 }
  0x96   : > { %685 = vmatprep.subr.mxu0 %v676_v27  ;;  %574 = vmatprep.mubr.f32.mxu0 %v1841_v0 }
  0x98   : > { %v667_v28 = vpop.permute.xlu0 %666  ;;  %v673_v29 = vpop.permute.xlu1 %672 }
  0x99   : > { %v677_v31 = vsel %vm674_vm3, %v671_v26, %v673_v29  ;;  %756 = vmatprep.subr.mxu1 %v673_v29  ;;  %v675_v32 = vsel %vm674_vm3, %v667_v28, %v669_v25 }
  0x9b   : > { %1759 = vmatmul.mubr.msk.f32.vlgmr.msra.gmra.mrb[0].mxu1 %vm198_vm1, %v1757_v30 }
  0x9c   : > { %757 = vmatpush1.msra.mxu1 %v677_v31  ;;  %v836_v33 = vpop.permute.xlu0 %835  ;;  %1758 = vmatmul.mubr.msk.f32.vlgmr.msra.gmra.mrb[0].mxu0 %vm198_vm1, %v1757_v30  ;;  %v838_v34 = vpop.permute.xlu1 %837 }
  0x9d   : > { %686 = vmatpush1.msra.mxu0 %v675_v32  ;;  %v843_v35 = vsel %vm841_vm4, %v836_v33, %v838_v34  ;;  %820 = vmatprep.mubr.f32.mxu1 %v1841_v0 }
  0x9e   : > { %852 = vmatprep.subr.mxu0 %v843_v35  ;;  %749 = vmatprep.mubr.f32.mxu0 %v1841_v0 }
  0xa0   : > { %v834_v36 = vpop.permute.xlu0 %833  ;;  %v840_v37 = vpop.permute.xlu1 %839 }
  0xa1   : > { %v844_v39 = vsel %vm841_vm4, %v838_v34, %v840_v37  ;;  %923 = vmatprep.subr.mxu1 %v840_v37  ;;  %v842_v40 = vsel %vm841_vm4, %v834_v36, %v836_v33 }
  0xa3   : > { %1762 = vmatmul.mubr.msk.f32.vlgmr.msra.gmra.mrb[0].mxu1 %vm198_vm1, %v1760_v38 }
  0xa4   : > { %924 = vmatpush1.msra.mxu1 %v844_v39  ;;  %v1003_v41 = vpop.permute.xlu0 %1002  ;;  %1761 = vmatmul.mubr.msk.f32.vlgmr.msra.gmra.mrb[0].mxu0 %vm198_vm1, %v1760_v38  ;;  %v1005_v42 = vpop.permute.xlu1 %1004 }
  0xa5   : > { %853 = vmatpush1.msra.mxu0 %v842_v40  ;;  %v1010_v43 = vsel %vm1008_vm5, %v1003_v41, %v1005_v42  ;;  %987 = vmatprep.mubr.f32.mxu1 %v1841_v0 }
  0xa6   : > { %1019 = vmatprep.subr.mxu0 %v1010_v43  ;;  %916 = vmatprep.mubr.f32.mxu0 %v1841_v0 }
  0xa8   : > { %v1001_v44 = vpop.permute.xlu0 %1000  ;;  %v1007_v45 = vpop.permute.xlu1 %1006 }
  0xa9   : > { %v1011_v47 = vsel %vm1008_vm5, %v1005_v42, %v1007_v45  ;;  %1090 = vmatprep.subr.mxu1 %v1007_v45  ;;  %v1009_v48 = vsel %vm1008_vm5, %v1001_v44, %v1003_v41 }
  0xab   : > { %1765 = vmatmul.mubr.msk.f32.vlgmr.msra.gmra.mrb[0].mxu1 %vm198_vm1, %v1763_v46 }
  0xac   : > { %1091 = vmatpush1.msra.mxu1 %v1011_v47  ;;  %v1178_v49 = vpop.permute.xlu0 %1177  ;;  %1764 = vmatmul.mubr.msk.f32.vlgmr.msra.gmra.mrb[0].mxu0 %vm198_vm1, %v1763_v46  ;;  %v1180_v50 = vpop.permute.xlu1 %1179 }
  0xad   : > { %1020 = vmatpush1.msra.mxu0 %v1009_v48  ;;  %v1185_v51 = vsel %vm1183_vm6, %v1178_v49, %v1180_v50  ;;  %1154 = vmatprep.mubr.f32.mxu1 %v1841_v0 }
  0xae   : > { %1194 = vmatprep.subr.mxu0 %v1185_v51  ;;  %1083 = vmatprep.mubr.f32.mxu0 %v1841_v0 }
  0xb0   : > { %v1176_v52 = vpop.permute.xlu0 %1175  ;;  %v1182_v53 = vpop.permute.xlu1 %1181 }
  0xb1   : > { %v1186_v55 = vsel %vm1183_vm6, %v1180_v50, %v1182_v53  ;;  %1265 = vmatprep.subr.mxu1 %v1182_v53  ;;  %v1184_v56 = vsel %vm1183_vm6, %v1176_v52, %v1178_v49 }
  0xb3   : > { %1768 = vmatmul.mubr.msk.f32.vlgmr.msra.gmra.mrb[0].mxu1 %vm198_vm1, %v1766_v54 }
  0xb4   : > { %1266 = vmatpush1.msra.mxu1 %v1186_v55  ;;  %v1345_v57 = vpop.permute.xlu0 %1344  ;;  %1767 = vmatmul.mubr.msk.f32.vlgmr.msra.gmra.mrb[0].mxu0 %vm198_vm1, %v1766_v54  ;;  %v1347_v58 = vpop.permute.xlu1 %1346 }
  0xb5   : > { %1195 = vmatpush1.msra.mxu0 %v1184_v56  ;;  %v1352_v59 = vsel %vm1350_vm7, %v1345_v57, %v1347_v58  ;;  %1329 = vmatprep.mubr.f32.mxu1 %v1841_v0 }
  0xb6   : > { %1361 = vmatprep.subr.mxu0 %v1352_v59  ;;  %1258 = vmatprep.mubr.f32.mxu0 %v1841_v0 }
  0xb8   : > { %v1343_v60 = vpop.permute.xlu0 %1342  ;;  %v1349_v61 = vpop.permute.xlu1 %1348 }
  0xb9   : > { %v1353_v63 = vsel %vm1350_vm7, %v1347_v58, %v1349_v61  ;;  %1432 = vmatprep.subr.mxu1 %v1349_v61  ;;  %v1351_v1 = vsel %vm1350_vm7, %v1343_v60, %v1345_v57 }
  0xbb   : > { %1771 = vmatmul.mubr.msk.f32.vlgmr.msra.gmra.mrb[0].mxu1 %vm198_vm1, %v1769_v62 }
  0xbc   : > { %1433 = vmatpush1.msra.mxu1 %v1353_v63  ;;  %v1512_v2 = vpop.permute.xlu0 %1511  ;;  %1770 = vmatmul.mubr.msk.f32.vlgmr.msra.gmra.mrb[0].mxu0 %vm198_vm1, %v1769_v62  ;;  %v1514_v3 = vpop.permute.xlu1 %1513 }
  0xbd   : > { %1362 = vmatpush1.msra.mxu0 %v1351_v1  ;;  %v1519_v4 = vsel %vm1517_vm8, %v1512_v2, %v1514_v3  ;;  %1496 = vmatprep.mubr.f32.mxu1 %v1841_v0 }
  0xbe   : > { %1528 = vmatprep.subr.mxu0 %v1519_v4  ;;  %1425 = vmatprep.mubr.f32.mxu0 %v1841_v0 }
  0xc0   : > { %v1510_v5 = vpop.permute.xlu0 %1509  ;;  %v1516_v6 = vpop.permute.xlu1 %1515 }
  0xc1   : > { %v1520_v8 = vsel %vm1517_vm8, %v1514_v3, %v1516_v6  ;;  %1599 = vmatprep.subr.mxu1 %v1516_v6  ;;  %v1518_v9 = vsel %vm1517_vm8, %v1510_v5, %v1512_v2 }
  0xc3   : > { %1774 = vmatmul.mubr.msk.f32.vlgmr.msra.gmra.mrb[0].mxu1 %vm198_vm1, %v1772_v7 }
  0xc4   : > { %1600 = vmatpush1.msra.mxu1 %v1520_v8  ;;  %1773 = vmatmul.mubr.msk.f32.vlgmr.msra.gmra.mrb[0].mxu0 %vm198_vm1, %v1772_v7 }
  0xc5   : > { %1529 = vmatpush1.msra.mxu0 %v1518_v9  ;;  %1663 = vmatprep.mubr.f32.mxu1 %v1841_v0 }
  0xc6   : > { %1592 = vmatprep.mubr.f32.mxu0 %v1841_v0 }
  0xcb   : > { %1777 = vmatmul.mubr.msk.f32.vlgmr.msra.gmra.mrb[0].mxu1 %vm198_vm1, %v1775_v10 }
  0xcc   : > { %1776 = vmatmul.mubr.msk.f32.vlgmr.msra.gmra.mrb[0].mxu0 %vm198_vm1, %v1775_v10 }
  0xd1   : > { %v1678_v11 = vpop.permute.xlu0 %1677 }
 0x19e   : > { %v1665_v12 = vpop.f32.mrb[0].mxu1 }
 0x19f   : > { %v1682_v13 = vadd.f32 %v1678_v11, %v1665_v12  ;;  %v1594_v14 = vpop.f32.mrb[0].mxu0  ;;  %v1667_v15 = vpop.f32.mrb[1].mxu1 }
 0x1a0   : > { %v1680_v0 = vadd.f32 %v1678_v11, %v1594_v14  ;;  %v1683_v16 = vadd.f32 %v1678_v11, %v1667_v15  ;;  %v1596_v17 = vpop.f32.mrb[1].mxu0 }
 0x1a1   : > { %1686 = vst [vmem:[%s170_s24 + $0x10] sm:$0xff] %v1682_v13  ;;  %v1681_v18 = vadd.f32 %v1678_v11, %v1596_v17 }
 0x1a2   : > { %1684 = vst [vmem:[%s170_s24] sm:$0xff] %v1680_v0  ;;  %1688 = vst.msk [vmem:[%s170_s24 + $0x18] sm:$0xff] %vm1687_vm9, %v1683_v16 }
 0x1a3   : > { %1685 = vst [vmem:[%s170_s24 + $0x8] sm:$0xff] %v1681_v18 }
 0x1a4 PF: > { %s13_s12 = sadd.s32 1, %s1839_s12  }
 0x1a5   : > { %p10_p4 = scmp.ge.s32.totalorder %s13_s12, 4  }
 0x1a7   :  { %12 = sbr.rel (!%p10_p4) target bundleno = 1 (0x1), region = 70 }

</bundles_post_ra>
